<compile_context>
chip_gen: v7x
topology: tpu7x:2x2x1
jax: 0.10.0
libtpu: 0.0.40
codegen_flags: <defaults>
</compile_context>

<pallas_src>
import functools
import math
import numbers

import jax
import jax.numpy as jnp
from jax import lax
from jax.experimental import pallas as pl
from jax.experimental.pallas import tpu as pltpu


# ----------------------------------------------------------------------------------
# Tap construction (compile-time Python floats -> baked into the kernel body).
# ----------------------------------------------------------------------------------
def _gauss_1d(size, std):
    """Normalized 1-D Gaussian taps as plain Python floats."""
    mean = (size - 1) / 2.0
    w = [
        math.exp(-(((i - mean) / std) ** 2) / 2.0) / (std * math.sqrt(2.0 * math.pi))
        for i in range(size)
    ]
    s = sum(w)
    return tuple(v / s for v in w)


def make_gauss_weight(channels, kernel_size, sigma, dim=2, dtype=jnp.float32):
    """Replicates gauss_filter.__init__ weight construction (shape (C,1,K0,K1)).

    Used only to build the reference conv for the correctness check."""
    if isinstance(kernel_size, numbers.Number):
        kernel_size = [kernel_size] * dim
    if isinstance(sigma, numbers.Number):
        sigma = [sigma] * dim
    grids = jnp.meshgrid(
        *[jnp.arange(s, dtype=jnp.float32) for s in kernel_size], indexing="ij"
    )
    kernel = jnp.ones((), jnp.float32)
    for size, std, mgrid in zip(kernel_size, sigma, grids):
        mean = (size - 1) / 2.0
        kernel = kernel * (
            1.0 / (std * math.sqrt(2.0 * math.pi))
            * jnp.exp(-(((mgrid - mean) / std) ** 2) / 2.0)
        )
    kernel = kernel / jnp.sum(kernel)
    kernel = kernel.reshape(1, 1, *kernel_size)
    kernel = jnp.tile(kernel, (channels, 1) + (1,) * len(kernel_size))
    return kernel.astype(dtype), tuple(int(k) for k in kernel_size)


# ----------------------------------------------------------------------------------
# Main kernel (odd kernel sizes): lane-dense flattened layout, roll-based passes.
# ----------------------------------------------------------------------------------
def _gauss_flat_kernel(x_ref, col_ref, o_ref, *, wy, wx, H, W):
    # x_ref, o_ref : (Cb, H*W)   one flattened image per sublane row (lane-dense)
    # col_ref      : (1,  H*W)   int32 pixel column index (p % W), grid-invariant
    HW = H * W
    k0, k1 = len(wy), len(wx)
    ph, pw = k0 // 2, k1 // 2

    x = x_ref[...].astype(jnp.float32)
    pos = lax.broadcasted_iota(jnp.int32, (1, HW), 1)   # flat pixel index
    col = col_ref[...]                                  # pixel column = pos % W

    # Vertical pass: K0 lane rotations by multiples of W (XLU) + masked FMAs (VPU).
    # The masks implement the conv zero padding (taps falling off the image).
    acc = None
    for ky in range(k0):
        s = ky - ph                                     # source-row offset of tap ky
        if s == 0:
            term = wy[ky] * x
        else:
            rolled = pltpu.roll(x, shift=(-s * W) % HW, axis=1)
            mask = pos < (HW - s * W) if s > 0 else pos >= (-s * W)
            term = jnp.where(mask, wy[ky] * rolled, 0.0)
        acc = term if acc is None else acc + term

    # Horizontal pass: K1 lane rotations by +-1..pw + per-row column masks.
    out = None
    for kx in range(k1):
        s = kx - pw
        if s == 0:
            term = wx[kx] * acc
        else:
            rolled = pltpu.roll(acc, shift=(-s) % HW, axis=1)
            mask = col < (W - s) if s > 0 else col >= (-s)
            term = jnp.where(mask, wx[kx] * rolled, 0.0)
        out = term if out is None else out + term

    o_ref[...] = out.astype(o_ref.dtype)                # dense, unmasked store


# ----------------------------------------------------------------------------------
# Fallback kernel (even kernel sizes -> Hout/Wout differ from H/W).
# ----------------------------------------------------------------------------------
def _gauss_general_kernel(x_ref, t_ref, o_ref, xpad_ref, *, wy, ph, h, hout, hpad):
    # x_ref   : (Cb, H, W)              t_ref : (W, Wout) banded Toeplitz
    # o_ref   : (Cb, Hout, Wout)        xpad_ref: (Cb, hpad + K0 - 1, W) f32 scratch
    k0 = len(wy)
    cb, _, w = x_ref.shape
    wout = o_ref.shape[2]
    hext = xpad_ref.shape[1]

    # Zero ONLY the halo rows (no full-scratch zero fill), then copy the image rows.
    if ph > 0:
        xpad_ref[:, :ph, :] = jnp.zeros((cb, ph, w), jnp.float32)
    if hext - ph - h > 0:
        xpad_ref[:, ph + h:, :] = jnp.zeros((cb, hext - ph - h, w), jnp.float32)
    xpad_ref[:, ph:ph + h, :] = x_ref[...].astype(jnp.float32)

    # Vertical pass: K0 sublane-shifted FMAs with compile-time scalar taps.  hpad is
    # a multiple of 8, so the matmul M dim and the reshapes below are layout-clean.
    acc = wy[0] * xpad_ref[:, 0:hpad, :]
    for ky in range(1, k0):
        acc = acc + wy[ky] * xpad_ref[:, ky:ky + hpad, :]

    # Horizontal pass: ONE banded-Toeplitz matmul on the MXU (W-axis zero padding is
    # baked into T); padded rows >= Hout are sliced off before the store.
    res = jnp.dot(acc.reshape(cb * hpad, w), t_ref[...],
                  preferred_element_type=jnp.float32)
    o_ref[...] = res.reshape(cb, hpad, wout)[:, :hout, :].astype(o_ref.dtype)


# ----------------------------------------------------------------------------------
# VMEM budgeting / tile selection.
# ----------------------------------------------------------------------------------
def _vmem_limit_bytes():
    """Per-generation scoped-VMEM limit: ~96 MiB on v5e/v6e, ~48 MiB on v7x."""
    try:
        cap = int(pltpu.get_tpu_info().vmem_capacity_bytes)
    except Exception:
        cap = 64 * 1024 * 1024          # conservative default (v7x per-core VMEM)
    return min(cap * 3 // 4, 112 * 1024 * 1024)


def _pick_block_channels(nc, per_chan_bytes, fixed_bytes, budget_bytes):
    """Largest channel block that fits the VMEM budget; 8-aligned sublane blocks."""
    avail = max(budget_bytes - fixed_bytes, per_chan_bytes)
    cb = int(max(1, min(nc, avail // max(per_chan_bytes, 1))))
    if nc > 8 and cb >= nc:
        cb = -(-nc // 2)                # prefer >=2 grid steps (v7x has 2 TensorCores)
    if cb < nc:
        cb = max(8, (cb // 8) * 8)      # multiple of 8 unless the block spans all nc
        cb = min(cb, nc)
    return cb


# ----------------------------------------------------------------------------------
# Public wrapper == gauss_filter.forward for dim=2.
# ----------------------------------------------------------------------------------
def gauss_filter_forward(x, kernel_size, sigma, dim=2):
    """Depthwise Gaussian blur == F.conv2d(x, weight, groups=C, padding=K//2)."""
    if dim != 2:
        # TODO(synk): dim=1 / dim=3 (F.conv1d / F.conv3d) branches are not implemented.
        raise NotImplementedError("only the dim=2 path used by sdm_unips is implemented")
    if isinstance(kernel_size, numbers.Number):
        kernel_size = [kernel_size] * 2
    if isinstance(sigma, numbers.Number):
        sigma = [sigma] * 2

    N, C, H, W = x.shape
    K0, K1 = int(kernel_size[0]), int(kernel_size[1])
    ph, pw = K0 // 2, K1 // 2
    Hout = H + 2 * ph - K0 + 1
    Wout = W + 2 * pw - K1 + 1

    # Separately-normalized 1-D taps; their outer product equals the module's
    # normalized 2-D kernel (the Gaussian is separable).
    wy = _gauss_1d(K0, float(sigma[0]))
    wx = _gauss_1d(K1, float(sigma[1]))

    NC = N * C
    itemsize = int(jnp.dtype(x.dtype).itemsize)
    vmem_limit = _vmem_limit_bytes()
    budget = int(vmem_limit * 0.85)

    if Hout == H and Wout == W:
        # ----------- main path: odd kernel sizes, lane-dense roll kernel -----------
        HW = H * W
        # per-channel residency: double-buffered in/out blocks + ~4 f32 temporaries
        per_chan = HW * (2 * itemsize + 2 * itemsize + 4 * 4)
        fixed = 2 * 4 * HW + (1 << 20)          # column-index table + slack
        Cb = _pick_block_channels(NC, per_chan, fixed, budget)

        xf = x.reshape(NC, HW)                  # contiguous reshape: layout-free
        col = (jnp.arange(HW, dtype=jnp.int32) % W).reshape(1, HW)

        kernel = functools.partial(_gauss_flat_kernel, wy=wy, wx=wx, H=H, W=W)
        out = pl.pallas_call(
            kernel,
            out_shape=jax.ShapeDtypeStruct((NC, HW), x.dtype),
            grid=(pl.cdiv(NC, Cb),),
            in_specs=[
                pl.BlockSpec((Cb, HW), lambda i: (i, 0)),
                # grid-invariant column-index table (tiny; single-buffering it via
                # pl.Buffered(1) would save one extra copy if VMEM ever got tight).
                pl.BlockSpec((1, HW), lambda i: (0, 0)),
            ],
            out_specs=pl.BlockSpec((Cb, HW), lambda i: (i, 0)),
            compiler_params=pltpu.CompilerParams(
                dimension_semantics=("parallel",),
                vmem_limit_bytes=int(vmem_limit)),
        )(xf, col)
        return out.reshape(N, C, H, W)

    # ----------- fallback path: even kernel sizes (Hout/Wout != H/W) ---------------
    hpad = -(-Hout // 8) * 8                    # pad matmul M dim to a multiple of 8
    hext = hpad + K0 - 1
    # Banded Toeplitz (W, Wout): out[., wo] = sum_w acc[., w] * T[w, wo], with the
    # conv zero padding baked in (out-of-range taps are zero).
    t_rows = [[wx[wi - wo + pw] if 0 <= wi - wo + pw < K1 else 0.0
               for wo in range(Wout)] for wi in range(W)]
    t = jnp.asarray(t_rows, dtype=jnp.float32)

    per_chan = (2 * itemsize * H * W + 2 * itemsize * Hout * Wout
                + 4 * (hext * W + hpad * W + hpad * Wout))
    fixed = 2 * 4 * W * Wout + (1 << 20)
    Cb = _pick_block_channels(NC, per_chan, fixed, budget)

    xr = x.reshape(NC, H, W)
    kernel = functools.partial(_gauss_general_kernel, wy=wy, ph=ph, h=H,
                               hout=Hout, hpad=hpad)
    out = pl.pallas_call(
        kernel,
        out_shape=jax.ShapeDtypeStruct((NC, Hout, Wout), x.dtype),
        grid=(pl.cdiv(NC, Cb),),
        in_specs=[
            pl.BlockSpec((Cb, H, W), lambda i: (i, 0, 0)),
            pl.BlockSpec((W, Wout), lambda i: (0, 0)),
        ],
        out_specs=pl.BlockSpec((Cb, Hout, Wout), lambda i: (i, 0, 0)),
        scratch_shapes=[pltpu.VMEM((Cb, hext, W), jnp.float32)],
        compiler_params=pltpu.CompilerParams(
            dimension_semantics=("parallel",),
            vmem_limit_bytes=int(vmem_limit)),
    )(xr, t)
    return out.reshape(N, C, Hout, Wout)


# ----------------------------------------------------------------------------------
# Self-test.
# ----------------------------------------------------------------------------------
def _reference(x, kernel_size, sigma):
    C = x.shape[1]
    weight, ks = make_gauss_weight(C, kernel_size, sigma, dim=2)
    return lax.conv_general_dilated(
        x, weight, window_strides=(1, 1),
        padding=((ks[0] // 2, ks[0] // 2), (ks[1] // 2, ks[1] // 2)),
        dimension_numbers=("NCHW", "OIHW", "NCHW"),
        feature_group_count=C)


if __name__ == "__main__":
    key = jax.random.PRNGKey(0)

    # Odd kernel size -> lane-dense roll path (the standard case).
    x = jax.random.normal(key, (2, 4, 16, 16), dtype=jnp.float32)
    out = jax.block_until_ready(gauss_filter_forward(x, 5, 2.0))
    ref = _reference(x, 5, 2.0)
    assert out.shape == ref.shape
    assert float(jnp.max(jnp.abs(out - ref))) < 1e-5

    # Even kernel size -> general halo-scratch + banded-Toeplitz fallback path.
    x2 = jax.random.normal(jax.random.PRNGKey(0), (1, 3, 10, 12), dtype=jnp.float32)
    out2 = jax.block_until_ready(gauss_filter_forward(x2, 4, 1.5))
    ref2 = _reference(x2, 4, 1.5)
    assert out2.shape == ref2.shape
    assert float(jnp.max(jnp.abs(out2 - ref2))) < 1e-5

    print("KERNEL_OK")
</pallas_src>

<mosaic_0001>
module attributes {stable_mosaic.version = 11 : i64} {
  func.func @_gauss_flat_kernel(%arg0: i32, %arg1: memref<8x256xf32, #tpu.memory_space<vmem>>, %arg2: memref<1x256xi32, #tpu.memory_space<vmem>>, %arg3: memref<8x256xf32, #tpu.memory_space<vmem>>) attributes {dimension_semantics = [#tpu.dimension_semantics<parallel>], iteration_bounds = array<i64: 1>, scalar_prefetch = 0 : i64, scratch_operands = 0 : i64, tpu.core_type = #tpu.core_type<tc>, window_params = [{transform_indices = @transform_0, window_bounds = array<i64: 8, 256>}, {pipeline_mode = #tpu.pipeline_mode<synchronous>, transform_indices = @transform_1, window_bounds = array<i64: 1, 256>}, {transform_indices = @transform_2, window_bounds = array<i64: 8, 256>}]} {
    %c0 = arith.constant 0 : index
    %c0_0 = arith.constant 0 : index
    %0 = vector.load %arg1[%c0, %c0_0] : memref<8x256xf32, #tpu.memory_space<vmem>>, vector<8x256xf32>
    %1 = tpu.iota {dimensions = array<i32: 1>} : vector<1x256xi32>
    %c0_1 = arith.constant 0 : index
    %c0_2 = arith.constant 0 : index
    %2 = vector.load %arg2[%c0_1, %c0_2] : memref<1x256xi32, #tpu.memory_space<vmem>>, vector<1x256xi32>
    %c32_i32 = arith.constant 32 : i32
    %3 = tpu.dynamic_rotate %0 by %c32_i32 dim 1 : vector<8x256xf32>, i32 -> vector<8x256xf32>
    %c32_i32_3 = arith.constant 32 : i32
    %4 = vector.broadcast %c32_i32_3 : i32 to vector<1x256xi32>
    %5 = arith.cmpi sge, %1, %4 : vector<1x256xi32>
    %cst = arith.constant 0.152469143 : f32
    %6 = vector.broadcast %cst : f32 to vector<8x256xf32>
    %7 = arith.mulf %6, %3 : vector<8x256xf32>
    %cst_4 = arith.constant 0.000000e+00 : f32
    %8 = vector.shape_cast %5 : vector<1x256xi1> to vector<1x256xi1>
    %9 = vector.broadcast %8 : vector<1x256xi1> to vector<8x256xi1>
    %10 = vector.broadcast %cst_4 : f32 to vector<8x256xf32>
    %11 = arith.select %9, %7, %10 : vector<8x256xi1>, vector<8x256xf32>
    %c16_i32 = arith.constant 16 : i32
    %12 = tpu.dynamic_rotate %0 by %c16_i32 dim 1 : vector<8x256xf32>, i32 -> vector<8x256xf32>
    %c16_i32_5 = arith.constant 16 : i32
    %13 = vector.broadcast %c16_i32_5 : i32 to vector<1x256xi32>
    %14 = arith.cmpi sge, %1, %13 : vector<1x256xi32>
    %cst_6 = arith.constant 0.221841291 : f32
    %15 = vector.broadcast %cst_6 : f32 to vector<8x256xf32>
    %16 = arith.mulf %15, %12 : vector<8x256xf32>
    %cst_7 = arith.constant 0.000000e+00 : f32
    %17 = vector.shape_cast %14 : vector<1x256xi1> to vector<1x256xi1>
    %18 = vector.broadcast %17 : vector<1x256xi1> to vector<8x256xi1>
    %19 = vector.broadcast %cst_7 : f32 to vector<8x256xf32>
    %20 = arith.select %18, %16, %19 : vector<8x256xi1>, vector<8x256xf32>
    %21 = arith.addf %11, %20 : vector<8x256xf32>
    %cst_8 = arith.constant 0.251379132 : f32
    %22 = vector.broadcast %cst_8 : f32 to vector<8x256xf32>
    %23 = arith.mulf %22, %0 : vector<8x256xf32>
    %24 = arith.addf %21, %23 : vector<8x256xf32>
    %c240_i32 = arith.constant 240 : i32
    %25 = tpu.dynamic_rotate %0 by %c240_i32 dim 1 : vector<8x256xf32>, i32 -> vector<8x256xf32>
    %c240_i32_9 = arith.constant 240 : i32
    %26 = vector.broadcast %c240_i32_9 : i32 to vector<1x256xi32>
    %27 = arith.cmpi slt, %1, %26 : vector<1x256xi32>
    %cst_10 = arith.constant 0.221841291 : f32
    %28 = vector.broadcast %cst_10 : f32 to vector<8x256xf32>
    %29 = arith.mulf %28, %25 : vector<8x256xf32>
    %cst_11 = arith.constant 0.000000e+00 : f32
    %30 = vector.shape_cast %27 : vector<1x256xi1> to vector<1x256xi1>
    %31 = vector.broadcast %30 : vector<1x256xi1> to vector<8x256xi1>
    %32 = vector.broadcast %cst_11 : f32 to vector<8x256xf32>
    %33 = arith.select %31, %29, %32 : vector<8x256xi1>, vector<8x256xf32>
    %34 = arith.addf %24, %33 : vector<8x256xf32>
    %c224_i32 = arith.constant 224 : i32
    %35 = tpu.dynamic_rotate %0 by %c224_i32 dim 1 : vector<8x256xf32>, i32 -> vector<8x256xf32>
    %c224_i32_12 = arith.constant 224 : i32
    %36 = vector.broadcast %c224_i32_12 : i32 to vector<1x256xi32>
    %37 = arith.cmpi slt, %1, %36 : vector<1x256xi32>
    %cst_13 = arith.constant 0.152469143 : f32
    %38 = vector.broadcast %cst_13 : f32 to vector<8x256xf32>
    %39 = arith.mulf %38, %35 : vector<8x256xf32>
    %cst_14 = arith.constant 0.000000e+00 : f32
    %40 = vector.shape_cast %37 : vector<1x256xi1> to vector<1x256xi1>
    %41 = vector.broadcast %40 : vector<1x256xi1> to vector<8x256xi1>
    %42 = vector.broadcast %cst_14 : f32 to vector<8x256xf32>
    %43 = arith.select %41, %39, %42 : vector<8x256xi1>, vector<8x256xf32>
    %44 = arith.addf %34, %43 : vector<8x256xf32>
    %c2_i32 = arith.constant 2 : i32
    %45 = tpu.dynamic_rotate %44 by %c2_i32 dim 1 : vector<8x256xf32>, i32 -> vector<8x256xf32>
    %c2_i32_15 = arith.constant 2 : i32
    %46 = vector.broadcast %c2_i32_15 : i32 to vector<1x256xi32>
    %47 = arith.cmpi sge, %2, %46 : vector<1x256xi32>
    %cst_16 = arith.constant 0.152469143 : f32
    %48 = vector.broadcast %cst_16 : f32 to vector<8x256xf32>
    %49 = arith.mulf %48, %45 : vector<8x256xf32>
    %cst_17 = arith.constant 0.000000e+00 : f32
    %50 = vector.shape_cast %47 : vector<1x256xi1> to vector<1x256xi1>
    %51 = vector.broadcast %50 : vector<1x256xi1> to vector<8x256xi1>
    %52 = vector.broadcast %cst_17 : f32 to vector<8x256xf32>
    %53 = arith.select %51, %49, %52 : vector<8x256xi1>, vector<8x256xf32>
    %c1_i32 = arith.constant 1 : i32
    %54 = tpu.dynamic_rotate %44 by %c1_i32 dim 1 : vector<8x256xf32>, i32 -> vector<8x256xf32>
    %c1_i32_18 = arith.constant 1 : i32
    %55 = vector.broadcast %c1_i32_18 : i32 to vector<1x256xi32>
    %56 = arith.cmpi sge, %2, %55 : vector<1x256xi32>
    %cst_19 = arith.constant 0.221841291 : f32
    %57 = vector.broadcast %cst_19 : f32 to vector<8x256xf32>
    %58 = arith.mulf %57, %54 : vector<8x256xf32>
    %cst_20 = arith.constant 0.000000e+00 : f32
    %59 = vector.shape_cast %56 : vector<1x256xi1> to vector<1x256xi1>
    %60 = vector.broadcast %59 : vector<1x256xi1> to vector<8x256xi1>
    %61 = vector.broadcast %cst_20 : f32 to vector<8x256xf32>
    %62 = arith.select %60, %58, %61 : vector<8x256xi1>, vector<8x256xf32>
    %63 = arith.addf %53, %62 : vector<8x256xf32>
    %cst_21 = arith.constant 0.251379132 : f32
    %64 = vector.broadcast %cst_21 : f32 to vector<8x256xf32>
    %65 = arith.mulf %64, %44 : vector<8x256xf32>
    %66 = arith.addf %63, %65 : vector<8x256xf32>
    %c255_i32 = arith.constant 255 : i32
    %67 = tpu.dynamic_rotate %44 by %c255_i32 dim 1 : vector<8x256xf32>, i32 -> vector<8x256xf32>
    %c15_i32 = arith.constant 15 : i32
    %68 = vector.broadcast %c15_i32 : i32 to vector<1x256xi32>
    %69 = arith.cmpi slt, %2, %68 : vector<1x256xi32>
    %cst_22 = arith.constant 0.221841291 : f32
    %70 = vector.broadcast %cst_22 : f32 to vector<8x256xf32>
    %71 = arith.mulf %70, %67 : vector<8x256xf32>
    %cst_23 = arith.constant 0.000000e+00 : f32
    %72 = vector.shape_cast %69 : vector<1x256xi1> to vector<1x256xi1>
    %73 = vector.broadcast %72 : vector<1x256xi1> to vector<8x256xi1>
    %74 = vector.broadcast %cst_23 : f32 to vector<8x256xf32>
    %75 = arith.select %73, %71, %74 : vector<8x256xi1>, vector<8x256xf32>
    %76 = arith.addf %66, %75 : vector<8x256xf32>
    %c254_i32 = arith.constant 254 : i32
    %77 = tpu.dynamic_rotate %44 by %c254_i32 dim 1 : vector<8x256xf32>, i32 -> vector<8x256xf32>
    %c14_i32 = arith.constant 14 : i32
    %78 = vector.broadcast %c14_i32 : i32 to vector<1x256xi32>
    %79 = arith.cmpi slt, %2, %78 : vector<1x256xi32>
    %cst_24 = arith.constant 0.152469143 : f32
    %80 = vector.broadcast %cst_24 : f32 to vector<8x256xf32>
    %81 = arith.mulf %80, %77 : vector<8x256xf32>
    %cst_25 = arith.constant 0.000000e+00 : f32
    %82 = vector.shape_cast %79 : vector<1x256xi1> to vector<1x256xi1>
    %83 = vector.broadcast %82 : vector<1x256xi1> to vector<8x256xi1>
    %84 = vector.broadcast %cst_25 : f32 to vector<8x256xf32>
    %85 = arith.select %83, %81, %84 : vector<8x256xi1>, vector<8x256xf32>
    %86 = arith.addf %76, %85 : vector<8x256xf32>
    %c0_26 = arith.constant 0 : index
    %c0_27 = arith.constant 0 : index
    %87 = vector.load %arg3[%c0_26, %c0_27] : memref<8x256xf32, #tpu.memory_space<vmem>>, vector<8x256xf32>
    tpu.vector_store %arg3[%c0_26, %c0_27], %86 {strides = array<i32>} : memref<8x256xf32, #tpu.memory_space<vmem>>, vector<8x256xf32>,
    return
  }
  func.func @transform_0(%arg0: i32) -> (i32, i32) {
    %c0_i32 = arith.constant 0 : i32
    %c0_i32_0 = arith.constant 0 : i32
    return %arg0, %c0_i32 : i32, i32
  }
  func.func @transform_1(%arg0: i32) -> (i32, i32) {
    %c0_i32 = arith.constant 0 : i32
    %c0_i32_0 = arith.constant 0 : i32
    %c0_i32_1 = arith.constant 0 : i32
    return %c0_i32, %c0_i32_0 : i32, i32
  }
  func.func @transform_2(%arg0: i32) -> (i32, i32) {
    %c0_i32 = arith.constant 0 : i32
    %c0_i32_0 = arith.constant 0 : i32
    return %arg0, %c0_i32 : i32, i32
  }
}

</mosaic_0001>

<bundles_post_ra>
// kernel: tpu_custom_call.1
= control target key start
LH: loop header
LB: loop body
LE: loop exit
PB: predicated region body
PF: predicated region fallthrough
CT: control target
= control target key end

     0   :  { %7 = vsyncpa [#allocation3], 0  ;;  %s398_s0 = inlined_call_operand.hbm [shape: f32[8,256], index: 0, kind: input, shape index: {}]   ;;  %s399_s1 = inlined_call_operand.vmem [shape: s32[1,256], index: 1, kind: input, shape index: {}]   ;;  %s400_s2 = inlined_call_operand.hbm [shape: f32[8,256], index: 2, kind: output, shape index: {}]  }
   0x1   :  { %8 = vsyncpa [#allocation4], 0  ;;  %s286_s9 = smov [#allocation2]   ;;  %s238_s13 = scalar_lea.hbm %s398_s0, 256 }
   0x2   :  { %s15_s10 = sshll.u32 %s286_s9, 4  ;;  %p239_p0 = scmp.ne.s32.totalorder %s398_s0, %s238_s13  ;;  %s16_s10 = int_to_ptr.vmem [resolvable:$true] %s15_s10 }
   0x3   :  { %p242_p1 = scmp.lt.u32.totalorder %s238_s13, %s398_s0 }
   0x5   :  { %p244_p2 = pnand %p242_p1, %p239_p0 }
   0x7   :  { %247 = shalt.err (!%p244_p2)
}
   0x8   :  { %s248_s18 = scalar_lea.vmem %s16_s10, 256  ;;  %p253_p4 = scmp.lt.s32.totalorder %s16_s10, %s16_s10 }
   0x9   :  { %p249_p3 = scmp.ne.s32.totalorder %s16_s10, %s248_s18  ;;  %p254_p5 = scmp.lt.s32.totalorder %s248_s18, %s248_s18 }
   0xb   :  { %p255_p6 = por %p254_p5, %p253_p4 }
   0xd   :  { %p256_p7 = pnand %p255_p6, %p249_p3 }
   0xf   :  { %259 = shalt.err (!%p256_p7)
}
  0x10   :  { %18 = dma.hbm_to_vmem [thread:$0]  %s398_s0, 256, %s16_s10, [#allocation3]  }
  0x11   :  { %282 = dma.done.wait [#allocation3], 256  }
  0x12   :  { %283 = vsyncadd [#allocation3], 4294967040  ;;  %v24_v0 = vld [vmem:[#allocation2] sm:$0xff]  ;;  %s287_s21 = smov 16   ;;  %s288_s22 = smov 32   ;;  %v25_v1 = vld [vmem:[#allocation2 + $0x8] sm:$0xff]  ;;  %v26_v2 = vlaneseq }
  0x13   :  { %47 = vrot.lane.b32.xlu1 %v24_v0, %s287_s21  ;;  %30 = vrot.lane.b32.xlu0 %v24_v0, %s288_s22  ;;  %s289_s23 = smov 112   ;;  %s290_s24 = smov 96   ;;  %v67_v16 = vmul.f32 0.25137913, %v25_v1  ;;  %v66_v18 = vmul.f32 0.25137913, %v24_v0 }
  0x14   :  { %v324_v3 = vand.u32 127, %v26_v2  ;;  %s291_s0 = smov 2   ;;  %s292_s25 = smov 1   ;;  %v29_v43 = vld [vmem:[%s399_s1] sm:$0x3]  ;;  %v120_v44 = vshrl.u32 %v26_v2, 7 }
  0x15   :  { %s293_s26 = smov 127   ;;  %s294_s27 = smov 126   ;;  %vm115_vm8 = vcmp.ge.s32.totalorder %v29_v43, 2  ;;  %vm138_vm9 = vcmp.ge.s32.totalorder %v29_v43, 1  ;;  %v295_v46 = vmov 0   ;;  %vm167_vm10 = vcmp.lt.s32.totalorder %v29_v43, 15 }
  0x16   :  { %vm51_vm0 = vcmp.lt.s32.totalorder %v324_v3, 16  ;;  %vm34_vm1 = vcmp.lt.s32.totalorder %v324_v3, 32  ;;  %vm54_vm2 = vcmp.ge.s32.totalorder %v324_v3, 16  ;;  %vm37_vm3 = vcmp.ge.s32.totalorder %v324_v3, 32  ;;  %s296_s1 = smov [#allocation5]  }
  0x17   :  { %49 = vrot.lane.b32.xlu1 %v25_v1, %s287_s21  ;;  %32 = vrot.lane.b32.xlu0 %v25_v1, %s288_s22  ;;  %v28_v8 = vadd.s32 128, %v324_v3  ;;  %vm74_vm4 = vcmp.lt.s32.totalorder %v324_v3, 112  ;;  %vm93_vm6 = vcmp.lt.s32.totalorder %v324_v3, 96  ;;  %v121_v45 = vsub.s32 0, %v120_v44  ;;  %s218_s30 = sshll.u32 %s296_s1, 4  ;;  %s219_s30 = int_to_ptr.vmem [resolvable:$true] %s218_s30 }
  0x18   :  { %v118_v47 = vsel %vm115_vm8, 1, %v295_v46  ;;  %v125_v48 = vsub.s32 1, %v120_v44  ;;  %v141_v49 = vsel %vm138_vm9, 1, %v295_v46  ;;  %vm112_vm11 = vcmp.lt.s32.totalorder %v324_v3, 2  ;;  %s260_s3 = scalar_lea.vmem %s219_s30, 256  ;;  %p265_p9 = scmp.lt.s32.totalorder %s219_s30, %s219_s30 }
  0x19   :  { %vm78_vm5 = vcmp.lt.s32.totalorder %v28_v8, 240  ;;  %vm97_vm7 = vcmp.lt.s32.totalorder %v28_v8, 224  ;;  %v122_v50 = vrot.slane %v118_v47, %v121_v45  ;;  %v145_v54 = vrot.slane %v141_v49, %v121_v45  ;;  %p261_p8 = scmp.ne.s32.totalorder %s219_s30, %s260_s3  ;;  %p266_p10 = scmp.lt.s32.totalorder %s260_s3, %s260_s3 }
  0x1a   :  { %v126_v52 = vrot.slane %v118_v47, %v125_v48  ;;  %v170_v55 = vsel %vm167_vm10, 1, %v295_v46  ;;  %v149_v58 = vrot.slane %v141_v49, %v125_v48  ;;  %vm192_vm12 = vcmp.lt.s32.totalorder %v29_v43, 14 }
  0x1b   :  { %72 = vrot.lane.b32.xlu1 %v25_v1, %s289_s23  ;;  %70 = vrot.lane.b32.xlu0 %v24_v0, %s289_s23  ;;  %vm343_vm13 = vcmp.eq.s32.totalorder %v122_v50, 1  ;;  %vm135_vm14 = vcmp.lt.s32.totalorder %v324_v3, 1  ;;  %v174_v62 = vrot.slane %v170_v55, %v121_v45  ;;  %v178_v63 = vrot.slane %v170_v55, %v125_v48  ;;  %p267_p11 = por %p266_p10, %p265_p9 }
  0x1c   :  { %vm348_vm15 = vcmp.eq.s32.totalorder %v126_v52, 1 }
  0x1d   :  { %p268_p12 = pnand %p267_p11, %p261_p8 }
  0x1f   :  { %91 = vrot.lane.b32.xlu1 %v25_v1, %s290_s24  ;;  %89 = vrot.lane.b32.xlu0 %v24_v0, %s290_s24 }
  0x85   :  { %v48_v4 = vpop.permute.xlu1 %47  ;;  %v31_v5 = vpop.permute.xlu0 %30 }
  0x89   :  { %v50_v6 = vpop.permute.xlu1 %49  ;;  %v33_v7 = vpop.permute.xlu0 %32 }
  0x8a   :  { %v52_v9 = vsel %vm51_vm0, %v48_v4, %v50_v6  ;;  %v53_v10 = vsel %vm51_vm0, %v50_v6, %v48_v4  ;;  %v35_v11 = vsel %vm34_vm1, %v31_v5, %v33_v7  ;;  %v36_v12 = vsel %vm34_vm1, %v33_v7, %v31_v5 }
  0x8b   :  { %v56_v13 = vmul.f32 0.22184129, %v53_v10  ;;  %v57_v14 = vmul.f32 0.22184129, %v52_v9  ;;  %v39_v15 = vmul.f32 0.15246914, %v36_v12 }
  0x8c   :  { %v40_v17 = vmul.f32 0.15246914, %v35_v11  ;;  %vm164_vm0 = vcmp.lt.s32.totalorder %v324_v3, 127  ;;  %vm353_vm1 = vcmp.eq.s32.totalorder %v145_v54, 1  ;;  %v195_v5 = vsel %vm192_vm12, 1, %v295_v46 }
  0x8d   :  { %v62_v19 = vsel %vm54_vm2, %v56_v13, 0.0  ;;  %v45_v20 = vsel %vm37_vm3, %v39_v15, 0.0  ;;  %v73_v21 = vpop.permute.xlu1 %72  ;;  %v71_v22 = vpop.permute.xlu0 %70  ;;  %vm357_vm2 = vcmp.eq.s32.totalorder %v149_v58, 1  ;;  %vm361_vm3 = vcmp.eq.s32.totalorder %v174_v62, 1 }
  0x8e   :  { %v64_v23 = vadd.f32 %v62_v19, %v45_v20  ;;  %v65_v24 = vadd.f32 %v57_v14, %v40_v17  ;;  %v75_v25 = vsel %vm74_vm4, %v71_v22, %v73_v21  ;;  %v76_v26 = vsel %vm74_vm4, %v73_v21, %v71_v22 }
  0x8f   :  { %v79_v27 = vmul.f32 0.22184129, %v75_v25  ;;  %v80_v28 = vmul.f32 0.22184129, %v76_v26  ;;  %vm365_vm4 = vcmp.eq.s32.totalorder %v178_v63, 1  ;;  %v203_v17 = vrot.slane %v195_v5, %v125_v48 }
  0x90   :  { %v69_v29 = vadd.f32 %v67_v16, %v65_v24  ;;  %v68_v30 = vadd.f32 %v66_v18, %v64_v23  ;;  %v199_v16 = vrot.slane %v195_v5, %v121_v45 }
  0x91   :  { %v86_v31 = vsel %vm78_vm5, %v80_v28, 0.0  ;;  %v92_v32 = vpop.permute.xlu1 %91  ;;  %v90_v33 = vpop.permute.xlu0 %89  ;;  %vm189_vm5 = vcmp.lt.s32.totalorder %v324_v3, 126 }
  0x92   :  { %v87_v34 = vadd.f32 %v79_v27, %v68_v30  ;;  %v94_v35 = vsel %vm93_vm6, %v90_v33, %v92_v32  ;;  %v95_v36 = vsel %vm93_vm6, %v92_v32, %v90_v33  ;;  %v88_v39 = vadd.f32 %v86_v31, %v69_v29 }
  0x93   :  { %v98_v37 = vmul.f32 0.15246914, %v94_v35  ;;  %v99_v38 = vmul.f32 0.15246914, %v95_v36  ;;  %vm204_vm6 = vcmp.eq.s32.totalorder %v199_v16, 1 }
  0x95   :  { %v105_v40 = vsel %vm97_vm7, %v99_v38, 0.0  ;;  %v106_v41 = vadd.f32 %v98_v37, %v87_v34  ;;  %vm205_vm7 = vcmp.eq.s32.totalorder %v203_v17, 1 }
  0x96   :  { %v107_v42 = vadd.f32 %v105_v40, %v88_v39 }
  0x97   :  { %108 = vrot.lane.b32.xlu0 %v106_v41, %s291_s0  ;;  %v156_v9 = vmul.f32 0.25137913, %v106_v41 }
  0x98   :  { %110 = vrot.lane.b32.xlu1 %v107_v42, %s291_s0  ;;  %v157_v12 = vmul.f32 0.25137913, %v107_v42 }
  0x9b   :  { %131 = vrot.lane.b32.xlu0 %v106_v41, %s292_s25 }
  0x9c   :  { %133 = vrot.lane.b32.xlu1 %v107_v42, %s292_s25 }
  0x9f   :  { %160 = vrot.lane.b32.xlu0 %v106_v41, %s293_s26 }
  0xa0   :  { %162 = vrot.lane.b32.xlu1 %v107_v42, %s293_s26 }
  0xa3   :  { %185 = vrot.lane.b32.xlu0 %v106_v41, %s294_s27 }
  0xa4   :  { %187 = vrot.lane.b32.xlu1 %v107_v42, %s294_s27 }
 0x109   :  { %v109_v51 = vpop.permute.xlu0 %108 }
 0x10a   :  { %v111_v53 = vpop.permute.xlu1 %110 }
 0x10b   :  { %v113_v56 = vsel %vm112_vm11, %v109_v51, %v111_v53  ;;  %v114_v57 = vsel %vm112_vm11, %v111_v53, %v109_v51 }
 0x10c   :  { %v116_v0 = vmul.f32 0.15246914, %v114_v57  ;;  %v117_v1 = vmul.f32 0.15246914, %v113_v56 }
 0x10d   :  { %v132_v61 = vpop.permute.xlu0 %131 }
 0x10e   :  { %v134_v4 = vpop.permute.xlu1 %133  ;;  %v129_v18 = vsel %vm343_vm13, %v116_v0, 0.0  ;;  %v130_v19 = vsel %vm348_vm15, %v117_v1, 0.0 }
 0x10f   :  { %v136_v7 = vsel %vm135_vm14, %v132_v61, %v134_v4  ;;  %v137_v8 = vsel %vm135_vm14, %v134_v4, %v132_v61 }
 0x110   :  { %v139_v10 = vmul.f32 0.22184129, %v137_v8  ;;  %v140_v11 = vmul.f32 0.22184129, %v136_v7 }
 0x111   :  { %v161_v13 = vpop.permute.xlu0 %160 }
 0x112   :  { %v152_v20 = vsel %vm353_vm1, %v139_v10, 0.0  ;;  %v153_v21 = vsel %vm357_vm2, %v140_v11, 0.0  ;;  %v163_v22 = vpop.permute.xlu1 %162 }
 0x113   :  { %v154_v23 = vadd.f32 %v152_v20, %v129_v18  ;;  %v155_v24 = vadd.f32 %v153_v21, %v130_v19  ;;  %v165_v25 = vsel %vm164_vm0, %v161_v13, %v163_v22  ;;  %v166_v26 = vsel %vm164_vm0, %v163_v22, %v161_v13 }
 0x114   :  { %v168_v27 = vmul.f32 0.22184129, %v165_v25  ;;  %v169_v28 = vmul.f32 0.22184129, %v166_v26 }
 0x115   :  { %v158_v29 = vadd.f32 %v156_v9, %v154_v23  ;;  %v159_v30 = vadd.f32 %v157_v12, %v155_v24  ;;  %v186_v31 = vpop.permute.xlu0 %185 }
 0x116   :  { %v181_v32 = vsel %vm361_vm3, %v168_v27, 0.0  ;;  %v182_v33 = vsel %vm365_vm4, %v169_v28, 0.0  ;;  %v188_v34 = vpop.permute.xlu1 %187 }
 0x117   :  { %v190_v35 = vsel %vm189_vm5, %v186_v31, %v188_v34  ;;  %v191_v36 = vsel %vm189_vm5, %v188_v34, %v186_v31  ;;  %v183_v39 = vadd.f32 %v181_v32, %v158_v29  ;;  %v184_v3 = vadd.f32 %v182_v33, %v159_v30 }
 0x118   :  { %v193_v37 = vmul.f32 0.15246914, %v190_v35  ;;  %v194_v38 = vmul.f32 0.15246914, %v191_v36 }
 0x11a   :  { %v206_v40 = vsel %vm204_vm6, %v193_v37, 0.0  ;;  %v207_v41 = vsel %vm205_vm7, %v194_v38, 0.0 }
 0x11b   :  { %v208_v42 = vadd.f32 %v206_v40, %v183_v39  ;;  %v209_v43 = vadd.f32 %v207_v41, %v184_v3 }
 0x11d   :  { %210 = vst [vmem:[#allocation5] sm:$0xff] %v208_v42  ;;  %211 = vst [vmem:[#allocation5 + $0x8] sm:$0xff] %v209_v43 }
 0x11e   :  { %271 = shalt.err (!%p268_p12)
}
 0x11f   :  { %s272_s6 = scalar_lea.hbm %s400_s2, 256 }
 0x120   :  { %p273_p13 = scmp.ne.s32.totalorder %s400_s2, %s272_s6  ;;  %p276_p0 = scmp.lt.u32.totalorder %s272_s6, %s400_s2 }
 0x122   :  { %p278_p1 = pnand %p276_p0, %p273_p13 }
 0x124   :  { %281 = shalt.err (!%p278_p1)
}
 0x125   :  { %221 = dma.vmem_to_hbm [thread:$0]  %s219_s30, 256, %s400_s2, [#allocation4]  }
 0x126   :  { %284 = dma.done.wait [#allocation4], 256  }
 0x127   :  { %285 = vsyncadd [#allocation4], 4294967040 }
 0x128   :  { %225 = vsyncpa [#allocation3], 1 }
 0x129   :  { %226 = vsyncpa [#allocation4], 1 }

</bundles_post_ra>
